<compile_context>
chip_gen: v6e
topology: v6e:2x2x1
jax: 0.10.0
libtpu: 0.0.40
codegen_flags: <defaults>
</compile_context>

<pallas_src>
import functools

import jax
import jax.numpy as jnp
import numpy as np
from jax import lax
from jax.experimental import pallas as pl
from jax.experimental.pallas import tpu as pltpu

POOL = 16
EPS = 1e-5


# --------------------------------- helpers ----------------------------------- #
def _round_up(a, b):
    return ((a + b - 1) // b) * b


@functools.lru_cache(maxsize=None)
def _tiling_params():
    """Per-generation (max_row_tile, vmem_ceiling_bytes).

    v5e/v6e: 128 MiB VMEM per TensorCore -> big row tiles, generous limit.
    v7x:      64 MiB per TC -> smaller tiles, ~40 MiB cap leaves compiler headroom.
    """
    try:
        cap = int(pltpu.get_tpu_info().vmem_capacity_bytes)
    except Exception:            # unknown -> assume the smallest (v7x-sized) VMEM
        cap = 64 << 20
    if cap >= (100 << 20):       # v5e / v6e
        return 2048, (96 << 20)
    return 1024, (40 << 20)      # v7x (or unknown)


def _clamp_vmem(est_bytes, ceil_bytes):
    return int(min(max(int(est_bytes) + (8 << 20), 16 << 20), ceil_bytes))


def _pick_row_tiling(R, max_tile_r):
    """Balanced row tiles: padding waste < 1 tile; prefer >=2 tiles so the
    'parallel' row axis can shard across both TensorCores on v7x."""
    n_tiles = pl.cdiv(R, max_tile_r)
    if n_tiles == 1 and R >= 512:
        n_tiles = 2
    tile_r = _round_up(pl.cdiv(R, n_tiles), 8)
    n_tiles = pl.cdiv(R, tile_r)
    return tile_r, n_tiles, tile_r * n_tiles


def _per_channel_row(v, Wt, Cp_pad):
    """(num_T,) -> (1, Cp_pad): channel value broadcast over its Wt lanes, 0 in padding."""
    num_T = v.shape[0]
    row = jnp.repeat(v, Wt)
    return jnp.pad(row, (0, Cp_pad - num_T * Wt))[None, :]


def _group_sum_matrix(num_T, Wt, Cp_pad):
    """(Cp_pad, Cp_pad) f32: M[i,j] = 1 iff lanes i and j belong to the same channel."""
    m = np.kron(np.eye(num_T, dtype=np.float32), np.ones((Wt, Wt), np.float32))
    pad = Cp_pad - num_T * Wt
    m = np.pad(m, ((0, pad), (0, pad)))
    return jnp.asarray(m)


# ------------- fused 3-branch conv + bias + ReLU + avgpool (+ stats) ---------- #
def _fused_branches_kernel(x_ref, B_ref, bias_ref, P_ref, o_ref, stats_ref,
                           *, tile_r, rows_valid):
    # x_ref   : (tile_r, W)          bf16
    # B_ref   : (W, Ct)              bf16  banded Toeplitz conv matrix
    # bias_ref: (1, Ct)              f32
    # P_ref   : (Ct, Cp_pad)         bf16  block-diagonal 1/16 pooling matrix (lane-padded)
    # o_ref   : (tile_r, Cp_pad)     f32   lane-dense pooled output
    # stats_ref: (1, 2, Cp_pad)      f32   per-tile column sum / sum-of-squares
    conv = jnp.dot(x_ref[...], B_ref[...], preferred_element_type=jnp.float32)
    conv = jnp.maximum(conv + bias_ref[...], 0.0)                 # bias + ReLU in f32
    pooled = jnp.dot(conv.astype(jnp.bfloat16), P_ref[...],
                     preferred_element_type=jnp.float32)
    o_ref[...] = pooled

    # Per-tile BN partials (mask rows past the true R so zero-padded rows,
    # whose pooled value is mean(relu(bias)) != 0, do not pollute the stats).
    row0 = pl.program_id(0) * tile_r
    rid = row0 + lax.broadcasted_iota(jnp.int32, pooled.shape, 0)
    pv = jnp.where(rid < rows_valid, pooled, 0.0)
    s1 = jnp.sum(pv, axis=0, keepdims=True)                       # (1, Cp_pad)
    s2 = jnp.sum(pv * pv, axis=0, keepdims=True)
    stats_ref[...] = jnp.concatenate([s1, s2], axis=0)[None, :, :]


# ---------- single-tile fast path: branches + BatchNorm fused in one call ----- #
def _fused_branches_bn_kernel(x_ref, B_ref, bias_ref, P_ref, Msum_ref,
                              gamma_row_ref, beta_row_ref, o_ref,
                              *, rows_valid, inv_count):
    conv = jnp.dot(x_ref[...], B_ref[...], preferred_element_type=jnp.float32)
    conv = jnp.maximum(conv + bias_ref[...], 0.0)
    pooled = jnp.dot(conv.astype(jnp.bfloat16), P_ref[...],
                     preferred_element_type=jnp.float32)

    rid = lax.broadcasted_iota(jnp.int32, pooled.shape, 0)
    pv = jnp.where(rid < rows_valid, pooled, 0.0)
    s1 = jnp.sum(pv, axis=0, keepdims=True)                       # (1, Cp_pad)
    s2 = jnp.sum(pv * pv, axis=0, keepdims=True)
    # Per-channel sums broadcast back to full lane width via the group-sum matrix
    # (keeps everything 128-lane dense; no 20-lane slices).
    ch_s1 = jnp.dot(s1, Msum_ref[...], preferred_element_type=jnp.float32)
    ch_s2 = jnp.dot(s2, Msum_ref[...], preferred_element_type=jnp.float32)
    mean = ch_s1 * inv_count
    var = ch_s2 * inv_count - mean * mean                         # biased variance
    scale = gamma_row_ref[...] * lax.rsqrt(var + EPS)
    shift = beta_row_ref[...] - mean * scale
    o_ref[...] = pooled * scale + shift


# --------------------------- tiled BatchNorm apply ---------------------------- #
def _bn_apply_kernel(y_ref, scale_ref, shift_ref, o_ref):
    # Full-lane-width fused scale/shift (scale/shift already per-lane rows).
    o_ref[...] = y_ref[...] * scale_ref[...] + shift_ref[...]


# -------------------- conv-as-matmul operand construction -------------------- #
def _build_conv_matmul_operands(ws, bs, W):
    """Build banded conv matrix B (bf16), bias row (f32), lane-padded pooling
    matrix P (bf16).  Column order is (channel t, branch i, time j) so the
    pooled output matches torch.cat along the time axis per channel."""
    num_T = ws[0].shape[0]
    w_outs = [W - w.shape[1] + 1 for w in ws]
    n_pools = [wo // POOL for wo in w_outs]
    Wc, Wt = sum(w_outs), sum(n_pools)
    Cp = num_T * Wt
    Cp_pad = _round_up(max(Cp, 128), 128)      # lane-dense output width

    b_blocks, bias_blocks = [], []
    for w, b in zip(ws, bs):
        k = w.shape[1]
        wo = W - k + 1
        tap = np.arange(W)[:, None] - np.arange(wo)[None, :]       # (W, wo)
        valid = (tap >= 0) & (tap < k)
        tapc = np.clip(tap, 0, k - 1).astype(np.int32)
        wt = jnp.where(jnp.asarray(valid)[None, :, :], w[:, tapc], 0.0)  # (num_T, W, wo)
        b_blocks.append(jnp.transpose(wt, (1, 0, 2)))               # (W, num_T, wo)
        bias_blocks.append(jnp.broadcast_to(b[:, None], (num_T, wo)))

    B = jnp.concatenate(b_blocks, axis=2).reshape(W, num_T * Wc).astype(jnp.bfloat16)
    bias_row = jnp.concatenate(bias_blocks, axis=1).reshape(1, num_T * Wc).astype(jnp.float32)

    # Constant block-diagonal average-pooling matrix (drops trailing remainder),
    # lane-padded with zero columns to Cp_pad.  1/16 is exact in bf16.
    P0 = np.zeros((Wc, Wt), np.float32)
    ro = co = 0
    for wo, npl_ in zip(w_outs, n_pools):
        for q in range(npl_):
            P0[ro + q * POOL: ro + (q + 1) * POOL, co + q] = 1.0 / POOL
        ro += wo
        co += npl_
    Pfull = np.kron(np.eye(num_T, dtype=np.float32), P0)            # (num_T*Wc, Cp)
    Pfull = np.pad(Pfull, ((0, 0), (0, Cp_pad - Cp)))
    P = jnp.asarray(Pfull).astype(jnp.bfloat16)
    return B, bias_row, P, Wt, Cp_pad


# --------------------------------- forward ----------------------------------- #
@jax.jit
def tception_forward(x, w1, b1, w2, b2, w3, b3, gamma, beta):
    N, Cin, H, W = x.shape
    assert Cin == 1
    num_T = w1.shape[0]
    R = N * H

    B, bias_row, P, Wt, Cp_pad = _build_conv_matmul_operands(
        [w1, w2, w3], [b1, b2, b3], W)
    Ct = B.shape[1]
    Cp = num_T * Wt

    max_tile_r, vmem_ceil = _tiling_params()
    tile_r, n_tiles, Rp = _pick_row_tiling(R, max_tile_r)

    x2d = x.reshape(R, W).astype(jnp.bfloat16)                     # half the HBM read
    if Rp != R:
        x2d = jnp.pad(x2d, ((0, Rp - R), (0, 0)))

    if n_tiles == 1:
        # ---------- small-R fast path: one kernel launch, BN fused ---------- #
        Msum = _group_sum_matrix(num_T, Wt, Cp_pad)
        gamma_row = _per_channel_row(gamma.astype(jnp.float32), Wt, Cp_pad)
        beta_row = _per_channel_row(beta.astype(jnp.float32), Wt, Cp_pad)
        vmem_limit = _clamp_vmem(
            Rp * W * 2 + W * Ct * 2 + Ct * 4 + Ct * Cp_pad * 2
            + Cp_pad * Cp_pad * 4 + 4 * Cp_pad * 4
            + 2 * Rp * Cp_pad * 4
            + Rp * Ct * 6,                                # conv temp (f32 + bf16 copy)
            vmem_ceil)
        kernel = functools.partial(_fused_branches_bn_kernel,
                                   rows_valid=R, inv_count=1.0 / float(R * Wt))
        y = pl.pallas_call(
            kernel,
            out_shape=jax.ShapeDtypeStruct((Rp, Cp_pad), jnp.float32),
            in_specs=[pl.BlockSpec(memory_space=pltpu.MemorySpace.VMEM)] * 7,
            out_specs=pl.BlockSpec(memory_space=pltpu.MemorySpace.VMEM),
            compiler_params=pltpu.CompilerParams(vmem_limit_bytes=vmem_limit),
        )(x2d, B, bias_row, P, Msum, gamma_row, beta_row)
    else:
        # ---------------- tiled path: fused branches + BN partials ---------- #
        vmem_limit = _clamp_vmem(
            2 * tile_r * W * 2          # x tiles (bf16, double-buffered)
            + 2 * W * Ct * 2            # B (bf16, resident; 2 pipeline copies)
            + 2 * Ct * 4                # bias row
            + 2 * Ct * Cp_pad * 2       # P (bf16)
            + 2 * tile_r * Cp_pad * 4   # pooled output tiles
            + 4 * Cp_pad * 4            # stats tiles
            + tile_r * Ct * 6,          # conv intermediate (f32 + bf16 copy)
            vmem_ceil)
        kernel = functools.partial(_fused_branches_kernel,
                                   tile_r=tile_r, rows_valid=R)
        pooled, partials = pl.pallas_call(
            kernel,
            out_shape=(jax.ShapeDtypeStruct((Rp, Cp_pad), jnp.float32),
                       jax.ShapeDtypeStruct((n_tiles, 2, Cp_pad), jnp.float32)),
            grid_spec=pltpu.PrefetchScalarGridSpec(
                num_scalar_prefetch=0,
                grid=(n_tiles,),
                in_specs=[
                    pl.BlockSpec((tile_r, W), lambda i: (i, 0)),
                    pl.BlockSpec((W, Ct), lambda i: (0, 0)),      # resident constants
                    pl.BlockSpec((1, Ct), lambda i: (0, 0)),
                    pl.BlockSpec((Ct, Cp_pad), lambda i: (0, 0)),
                ],
                out_specs=[
                    pl.BlockSpec((tile_r, Cp_pad), lambda i: (i, 0)),
                    pl.BlockSpec((1, 2, Cp_pad), lambda i: (i, 0, 0)),
                ],
            ),
            compiler_params=pltpu.CompilerParams(
                dimension_semantics=("parallel",),                # 2 TCs on v7x
                vmem_limit_bytes=vmem_limit,
            ),
        )(x2d, B, bias_row, P)

        # Tiny XLA reduction of per-tile partials -> per-channel scale/shift rows.
        stats = jnp.sum(partials, axis=0)                          # (2, Cp_pad)
        cnt = float(R * Wt)
        s1 = jnp.sum(stats[0, :Cp].reshape(num_T, Wt), axis=1)
        s2 = jnp.sum(stats[1, :Cp].reshape(num_T, Wt), axis=1)
        mean = s1 / cnt
        var = s2 / cnt - mean * mean                               # biased variance
        scale = gamma.astype(jnp.float32) * lax.rsqrt(var + EPS)
        shift = beta.astype(jnp.float32) - mean * scale
        scale_row = _per_channel_row(scale, Wt, Cp_pad)
        shift_row = _per_channel_row(shift, Wt, Cp_pad)

        # Row-tiled, full-lane-width BN apply (pipelined, megacore-parallel).
        y = pl.pallas_call(
            _bn_apply_kernel,
            out_shape=jax.ShapeDtypeStruct((Rp, Cp_pad), jnp.float32),
            grid_spec=pltpu.PrefetchScalarGridSpec(
                num_scalar_prefetch=0,
                grid=(n_tiles,),
                in_specs=[
                    pl.BlockSpec((tile_r, Cp_pad), lambda i: (i, 0)),
                    pl.BlockSpec((1, Cp_pad), lambda i: (0, 0)),
                    pl.BlockSpec((1, Cp_pad), lambda i: (0, 0)),
                ],
                out_specs=pl.BlockSpec((tile_r, Cp_pad), lambda i: (i, 0)),
            ),
            compiler_params=pltpu.CompilerParams(
                dimension_semantics=("parallel",),
                vmem_limit_bytes=_clamp_vmem(4 * tile_r * Cp_pad * 4 + 4 * Cp_pad * 4,
                                             vmem_ceil),
            ),
        )(pooled, scale_row, shift_row)

    # Single layout fixup: drop row/lane padding, back to NCHW.
    y = y[:R, :Cp]
    return y.reshape(N, H, num_T, Wt).transpose(0, 2, 1, 3)        # (N, num_T, H, Wt)


# ----------------------------- pure-JAX reference ----------------------------- #
def ref_forward(x, branches, gamma, beta):
    outs = []
    for (w, b) in branches:
        num_T, k = w.shape
        w4 = w.reshape(num_T, 1, 1, k)
        y = lax.conv_general_dilated(
            x, w4, window_strides=(1, 1), padding="VALID",
            dimension_numbers=("NCHW", "OIHW", "NCHW"),
            precision=lax.Precision.HIGHEST)
        y = y + b[None, :, None, None]
        y = jnp.maximum(y, 0.0)
        n_pool = y.shape[-1] // POOL
        y = y[..., : n_pool * POOL]
        y = y.reshape(*y.shape[:-1], n_pool, POOL).mean(-1)
        outs.append(y)
    out = jnp.concatenate(outs, axis=-1)
    mean = out.mean(axis=(0, 2, 3), keepdims=True)
    var = ((out - mean) ** 2).mean(axis=(0, 2, 3), keepdims=True)
    return ((out - mean) * lax.rsqrt(var + EPS)
            * gamma[None, :, None, None] + beta[None, :, None, None])


# ------------------------------------ main ------------------------------------ #
if __name__ == "__main__":
    sampling_rate = 64
    num_T = 4
    W = 128

    # kernel widths from the inception windows: int(window * fs) -> 32, 16, 8
    ksizes = [int(0.5 * sampling_rate),
              int(0.25 * sampling_rate),
              int(0.125 * sampling_rate)]

    key = jax.random.PRNGKey(0)
    keys = jax.random.split(key, 2 * len(ksizes) + 4)

    branches = []
    for i, k in enumerate(ksizes):
        w = (0.1 * jax.random.normal(keys[2 * i], (num_T, k))).astype(jnp.float32)
        b = (0.1 * jax.random.normal(keys[2 * i + 1], (num_T,))).astype(jnp.float32)
        branches.append((w, b))
    gamma = (1.0 + 0.1 * jax.random.normal(keys[-4], (num_T,))).astype(jnp.float32)
    beta = (0.1 * jax.random.normal(keys[-3], (num_T,))).astype(jnp.float32)

    def run_case(x):
        out = tception_forward(
            x,
            branches[0][0], branches[0][1],
            branches[1][0], branches[1][1],
            branches[2][0], branches[2][1],
            gamma, beta)
        out = jax.block_until_ready(out)
        ref = ref_forward(x, branches, gamma, beta)
        assert out.shape == ref.shape, (out.shape, ref.shape)
        # bf16 MXU operands (f32 accumulation) + BN normalization amplification:
        # a few % on the unit-scale normalized output is expected.
        np.testing.assert_allclose(np.asarray(out), np.asarray(ref),
                                   atol=3e-2, rtol=3e-2)

    # Small case: single-tile fast path (conv+ReLU+pool+BN in ONE kernel launch).
    run_case(jax.random.normal(keys[-2], (2, 1, 4, W), dtype=jnp.float32))
    # Larger case: exercises the row-tiled path (fused kernel w/ BN partials +
    # tiled BN apply) on every TPU generation.
    run_case(jax.random.normal(keys[-1], (8, 1, 256, W), dtype=jnp.float32))

    print("KERNEL_OK")
</pallas_src>

<mosaic_0001>
module attributes {stable_mosaic.version = 11 : i64} {
  func.func @_fused_branches_bn_kernel(%arg0: memref<8x128xbf16, #tpu.memory_space<vmem>>, %arg1: memref<128x1324xbf16, #tpu.memory_space<vmem>>, %arg2: memref<1x1324xf32, #tpu.memory_space<vmem>>, %arg3: memref<1324x128xbf16, #tpu.memory_space<vmem>>, %arg4: memref<128x128xf32, #tpu.memory_space<vmem>>, %arg5: memref<1x128xf32, #tpu.memory_space<vmem>>, %arg6: memref<1x128xf32, #tpu.memory_space<vmem>>, %arg7: memref<8x128xf32, #tpu.memory_space<vmem>>) attributes {dimension_semantics = [], scalar_prefetch = 0 : i64, scratch_operands = 0 : i64, tpu.core_type = #tpu.core_type<tc>} {
    %c0 = arith.constant 0 : index
    %c0_0 = arith.constant 0 : index
    %0 = vector.load %arg0[%c0, %c0_0] : memref<8x128xbf16, #tpu.memory_space<vmem>>, vector<8x128xbf16>
    %c0_1 = arith.constant 0 : index
    %c0_2 = arith.constant 0 : index
    %1 = vector.load %arg1[%c0_1, %c0_2] : memref<128x1324xbf16, #tpu.memory_space<vmem>>, vector<128x1324xbf16>
    %cst = arith.constant dense<0.000000e+00> : vector<8x1324xf32>
    %2 = tpu.matmul %0, %1, %cst {dimension_numbers = #tpu.dot_dimension_numbers<[1], [0], [0], [1], [0, 0, 1, 1], [], []>} : vector<8x128xbf16>, vector<128x1324xbf16>, vector<8x1324xf32> -> vector<8x1324xf32>
    %c0_3 = arith.constant 0 : index
    %c0_4 = arith.constant 0 : index
    %3 = vector.load %arg2[%c0_3, %c0_4] : memref<1x1324xf32, #tpu.memory_space<vmem>>, vector<1x1324xf32>
    %4 = vector.broadcast %3 : vector<1x1324xf32> to vector<8x1324xf32>
    %5 = arith.addf %2, %4 : vector<8x1324xf32>
    %cst_5 = arith.constant 0.000000e+00 : f32
    %6 = vector.broadcast %cst_5 : f32 to vector<8x1324xf32>
    %7 = arith.maximumf %5, %6 : vector<8x1324xf32>
    %8 = arith.truncf %7 : vector<8x1324xf32> to vector<8x1324xbf16>
    %c0_6 = arith.constant 0 : index
    %c0_7 = arith.constant 0 : index
    %9 = vector.load %arg3[%c0_6, %c0_7] : memref<1324x128xbf16, #tpu.memory_space<vmem>>, vector<1324x128xbf16>
    %cst_8 = arith.constant dense<0.000000e+00> : vector<8x128xf32>
    %10 = tpu.matmul %8, %9, %cst_8 {dimension_numbers = #tpu.dot_dimension_numbers<[1], [0], [0], [1], [0, 0, 1, 1], [], []>} : vector<8x1324xbf16>, vector<1324x128xbf16>, vector<8x128xf32> -> vector<8x128xf32>
    %11 = tpu.iota {dimensions = array<i32: 0>} : vector<8x128xi32>
    %c8_i32 = arith.constant 8 : i32
    %12 = vector.broadcast %c8_i32 : i32 to vector<8x128xi32>
    %13 = arith.cmpi slt, %11, %12 : vector<8x128xi32>
    %cst_9 = arith.constant 0.000000e+00 : f32
    %14 = vector.broadcast %cst_9 : f32 to vector<8x128xf32>
    %15 = arith.select %13, %10, %14 : vector<8x128xi1>, vector<8x128xf32>
    %cst_10 = arith.constant dense<0.000000e+00> : vector<128xf32>
    %16 = vector.multi_reduction <add>, %15, %cst_10 [0] : vector<8x128xf32> to vector<128xf32>
    %17 = vector.shape_cast %16 : vector<128xf32> to vector<1x128xf32>
    %18 = arith.mulf %15, %15 : vector<8x128xf32>
    %cst_11 = arith.constant dense<0.000000e+00> : vector<128xf32>
    %19 = vector.multi_reduction <add>, %18, %cst_11 [0] : vector<8x128xf32> to vector<128xf32>
    %20 = vector.shape_cast %19 : vector<128xf32> to vector<1x128xf32>
    %c0_12 = arith.constant 0 : index
    %c0_13 = arith.constant 0 : index
    %21 = vector.load %arg4[%c0_12, %c0_13] : memref<128x128xf32, #tpu.memory_space<vmem>>, vector<128x128xf32>
    %cst_14 = arith.constant dense<0.000000e+00> : vector<1x128xf32>
    %22 = tpu.matmul %17, %21, %cst_14 {dimension_numbers = #tpu.dot_dimension_numbers<[1], [0], [0], [1], [0, 0, 1, 1], [], []>} : vector<1x128xf32>, vector<128x128xf32>, vector<1x128xf32> -> vector<1x128xf32>
    %c0_15 = arith.constant 0 : index
    %c0_16 = arith.constant 0 : index
    %23 = vector.load %arg4[%c0_15, %c0_16] : memref<128x128xf32, #tpu.memory_space<vmem>>, vector<128x128xf32>
    %cst_17 = arith.constant dense<0.000000e+00> : vector<1x128xf32>
    %24 = tpu.matmul %20, %23, %cst_17 {dimension_numbers = #tpu.dot_dimension_numbers<[1], [0], [0], [1], [0, 0, 1, 1], [], []>} : vector<1x128xf32>, vector<128x128xf32>, vector<1x128xf32> -> vector<1x128xf32>
    %cst_18 = arith.constant 6.250000e-03 : f32
    %25 = vector.broadcast %cst_18 : f32 to vector<1x128xf32>
    %26 = arith.mulf %22, %25 : vector<1x128xf32>
    %cst_19 = arith.constant 6.250000e-03 : f32
    %27 = vector.broadcast %cst_19 : f32 to vector<1x128xf32>
    %28 = arith.mulf %24, %27 : vector<1x128xf32>
    %29 = arith.mulf %26, %26 : vector<1x128xf32>
    %30 = arith.subf %28, %29 : vector<1x128xf32>
    %c0_20 = arith.constant 0 : index
    %c0_21 = arith.constant 0 : index
    %31 = vector.load %arg5[%c0_20, %c0_21] : memref<1x128xf32, #tpu.memory_space<vmem>>, vector<1x128xf32>
    %cst_22 = arith.constant 9.99999974E-6 : f32
    %32 = vector.broadcast %cst_22 : f32 to vector<1x128xf32>
    %33 = arith.addf %30, %32 : vector<1x128xf32>
    %34 = math.rsqrt %33 : vector<1x128xf32>
    %35 = arith.mulf %31, %34 : vector<1x128xf32>
    %c0_23 = arith.constant 0 : index
    %c0_24 = arith.constant 0 : index
    %36 = vector.load %arg6[%c0_23, %c0_24] : memref<1x128xf32, #tpu.memory_space<vmem>>, vector<1x128xf32>
    %37 = arith.mulf %26, %35 : vector<1x128xf32>
    %38 = arith.subf %36, %37 : vector<1x128xf32>
    %39 = vector.broadcast %35 : vector<1x128xf32> to vector<8x128xf32>
    %40 = arith.mulf %10, %39 : vector<8x128xf32>
    %41 = vector.broadcast %38 : vector<1x128xf32> to vector<8x128xf32>
    %42 = arith.addf %40, %41 : vector<8x128xf32>
    %c0_25 = arith.constant 0 : index
    %c0_26 = arith.constant 0 : index
    %43 = vector.load %arg7[%c0_25, %c0_26] : memref<8x128xf32, #tpu.memory_space<vmem>>, vector<8x128xf32>
    tpu.vector_store %arg7[%c0_25, %c0_26], %42 {strides = array<i32>} : memref<8x128xf32, #tpu.memory_space<vmem>>, vector<8x128xf32>,
    return
  }
}

</mosaic_0001>

<bundles_post_ra>
// kernel: tception_forward.1
= control target key start
LH: loop header
LB: loop body
LE: loop exit
PB: predicated region body
PF: predicated region fallthrough
CT: control target
= control target key end

     0   :  { %v2657_v1 = vmov 0   ;;  %vm2659_vm0 = vmmov 0   ;;  %vm1565_vm1 = vcmask 1045504   ;;  %vm1561_vm2 = vcmask 359424   ;;  %s3377_s1 = inlined_call_operand.vmem [shape: bf16[128,1324], index: 1, kind: input, shape index: {}]   ;;  %s3378_s0 = inlined_call_operand.vmem [shape: bf16[8,128], index: 0, kind: input, shape index: {}]   ;;  %s3379_s3 = inlined_call_operand.vmem [shape: bf16[1324,128], index: 3, kind: input, shape index: {}]   ;;  %s3380_s2 = inlined_call_operand.vmem [shape: f32[1,1324], index: 2, kind: input, shape index: {}]   ;;  %s3381_s4 = inlined_call_operand.vmem [shape: f32[128,128], index: 4, kind: input, shape index: {}]   ;;  %s3382_s5 = inlined_call_operand.vmem [shape: f32[1,128], index: 5, kind: input, shape index: {}]   ;;  %s3383_s6 = inlined_call_operand.vmem [shape: f32[1,128], index: 6, kind: input, shape index: {}]   ;;  %s3384_s7 = inlined_call_operand.vmem [shape: f32[8,128], index: 7, kind: output, shape index: {}]  }
   0x1   :  { %v2444_v0 = vld [vmem:[%s3377_s1 + $0x26c] ss:$44 sps:$4 sm:$0xff]   ;;  %663 = vmatprep.mubr.bf16.mxu0 %v2657_v1  ;;  %704 = vmatprep.mubr.bf16.mxu1 %v2657_v1  ;;  %v2446_v2 = vld [vmem:[%s3377_s1 + $0x274] ss:$44 sps:$4 sm:$0xff]   ;;  %v2449_v4 = vld [vmem:[%s3377_s1 + $0x270] ss:$44 sps:$4 sm:$0xff]  }
   0x2   :  { %631 = vmatprep.subr.bf16.mxu0 %v2444_v0  ;;  %v2448_v3 = vld [vmem:[%s3377_s1 + $0x268] ss:$44 sps:$4 sm:$0xff]   ;;  %672 = vmatprep.subr.bf16.mxu1 %v2446_v2  ;;  %v2454_v7 = vld [vmem:[%s3377_s1 + $0x210] ss:$44 sps:$4 sm:$0xff]   ;;  %v2455_v8 = vld [vmem:[%s3377_s1 + $0x218] ss:$44 sps:$4 sm:$0xff]  }
   0x3   :  { %v2450_v5 = vld [vmem:[%s3377_s1 + $0x214] ss:$44 sps:$4 sm:$0xff]   ;;  %632 = vmatpush1.bf16.msra.mxu0 %v2448_v3  ;;  %673 = vmatpush1.bf16.msra.mxu1 %v2449_v4  ;;  %v2452_v6 = vld [vmem:[%s3377_s1 + $0x21c] ss:$44 sps:$4 sm:$0xff]   ;;  %v2458_v10 = vld [vmem:[%s3377_s1 + $0x1c4] ss:$44 sps:$4 sm:$0xff]  }
   0x4   :  { %633 = vmatprep.subr.bf16.mxu0 %v2450_v5  ;;  %674 = vmatprep.subr.bf16.mxu1 %v2452_v6  ;;  %v2456_v9 = vld [vmem:[%s3377_s1 + $0x1bc] ss:$44 sps:$4 sm:$0xff]   ;;  %v2460_v11 = vld [vmem:[%s3377_s1 + $0x1b8] ss:$44 sps:$4 sm:$0xff]   ;;  %v2461_v12 = vld [vmem:[%s3377_s1 + $0x1c0] ss:$44 sps:$4 sm:$0xff]  }
   0x5   :  { %v2462_v13 = vld [vmem:[%s3377_s1 + $0x164] ss:$44 sps:$4 sm:$0xff]   ;;  %v2464_v14 = vld [vmem:[%s3377_s1 + $0x16c] ss:$44 sps:$4 sm:$0xff]   ;;  %v2467_v16 = vld [vmem:[%s3377_s1 + $0x168] ss:$44 sps:$4 sm:$0xff]  }
   0x6   :  { %v2466_v15 = vld [vmem:[%s3377_s1 + $0x160] ss:$44 sps:$4 sm:$0xff]   ;;  %v2472_v19 = vld [vmem:[%s3377_s1 + $0x108] ss:$44 sps:$4 sm:$0xff]   ;;  %v2473_v20 = vld [vmem:[%s3377_s1 + $0x110] ss:$44 sps:$4 sm:$0xff]  }
   0x7   :  { %634 = vmatpush1.bf16.msra.mxu0 %v2454_v7  ;;  %675 = vmatpush1.bf16.msra.mxu1 %v2455_v8  ;;  %v2468_v17 = vld [vmem:[%s3377_s1 + $0x10c] ss:$44 sps:$4 sm:$0xff]   ;;  %v2470_v18 = vld [vmem:[%s3377_s1 + $0x114] ss:$44 sps:$4 sm:$0xff]   ;;  %v2476_v22 = vld [vmem:[%s3377_s1 + $0xbc] ss:$44 sps:$4 sm:$0xff]  }
   0x8   :  { %635 = vmatprep.subr.bf16.mxu0 %v2456_v9  ;;  %676 = vmatprep.subr.bf16.mxu1 %v2458_v10  ;;  %v2474_v21 = vld [vmem:[%s3377_s1 + $0xb4] ss:$44 sps:$4 sm:$0xff]   ;;  %v2478_v23 = vld [vmem:[%s3377_s1 + $0xb0] ss:$44 sps:$4 sm:$0xff]   ;;  %v2479_v24 = vld [vmem:[%s3377_s1 + $0xb8] ss:$44 sps:$4 sm:$0xff]  }
   0x9   :  { %v2480_v25 = vld [vmem:[%s3377_s1 + $0x5c] ss:$44 sps:$4 sm:$0xff]   ;;  %v2482_v26 = vld [vmem:[%s3377_s1 + $0x64] ss:$44 sps:$4 sm:$0xff]   ;;  %v2485_v28 = vld [vmem:[%s3377_s1 + $0x60] ss:$44 sps:$4 sm:$0xff]  }
   0xa   :  { %v2484_v27 = vld [vmem:[%s3377_s1 + $0x58] ss:$44 sps:$4 sm:$0xff]   ;;  %v2490_v31 = vld [vmem:[%s3377_s1] ss:$44 sps:$4 sm:$0xff]   ;;  %v2491_v32 = vld [vmem:[%s3377_s1 + $0x8] ss:$44 sps:$4 sm:$0xff]  }
   0xb   :  { %636 = vmatpush1.bf16.msra.mxu0 %v2460_v11  ;;  %677 = vmatpush1.bf16.msra.mxu1 %v2461_v12  ;;  %v2486_v29 = vld [vmem:[%s3377_s1 + $0x4] ss:$44 sps:$4 sm:$0xff]   ;;  %v2488_v30 = vld [vmem:[%s3377_s1 + $0xc] ss:$44 sps:$4 sm:$0xff]   ;;  %v2494_v33 = vld [vmem:[%s3377_s1 + $0x27c] ss:$44 sps:$4 sm:$0xff]  }
   0xc   :  { %637 = vmatprep.subr.bf16.mxu0 %v2462_v13  ;;  %678 = vmatprep.subr.bf16.mxu1 %v2464_v14  ;;  %v2497_v34 = vld [vmem:[%s3377_s1 + $0x284] ss:$44 sps:$4 sm:$0xff]   ;;  %v2807_v35 = vld [vmem:[%s3378_s0] sm:$0xf]  ;;  %v2503_v39 = vld [vmem:[%s3377_s1 + $0x22c] ss:$44 sps:$4 sm:$0xff]  }
   0xd   :  { %v2492_v36 = vld [vmem:[%s3377_s1 + $0x278] ss:$44 sps:$4 sm:$0xff]   ;;  %v2495_v37 = vld [vmem:[%s3377_s1 + $0x280] ss:$44 sps:$4 sm:$0xff]   ;;  %v2501_v41 = vld [vmem:[%s3377_s1 + $0x228] ss:$44 sps:$4 sm:$0xff]  }
   0xe   :  { %v2500_v38 = vld [vmem:[%s3377_s1 + $0x224] ss:$44 sps:$4 sm:$0xff]   ;;  %v2498_v40 = vld [vmem:[%s3377_s1 + $0x220] ss:$44 sps:$4 sm:$0xff]   ;;  %v2504_v44 = vld [vmem:[%s3377_s1 + $0x1c8] ss:$44 sps:$4 sm:$0xff]  }
   0xf   :  { %638 = vmatpush1.bf16.msra.mxu0 %v2466_v15  ;;  %679 = vmatpush1.bf16.msra.mxu1 %v2467_v16  ;;  %v2506_v42 = vld [vmem:[%s3377_s1 + $0x1cc] ss:$44 sps:$4 sm:$0xff]   ;;  %v2509_v43 = vld [vmem:[%s3377_s1 + $0x1d4] ss:$44 sps:$4 sm:$0xff]   ;;  %v2507_v45 = vld [vmem:[%s3377_s1 + $0x1d0] ss:$44 sps:$4 sm:$0xff]  }
  0x10   :  { %639 = vmatprep.subr.bf16.mxu0 %v2468_v17  ;;  %680 = vmatprep.subr.bf16.mxu1 %v2470_v18  ;;  %v2512_v46 = vld [vmem:[%s3377_s1 + $0x174] ss:$44 sps:$4 sm:$0xff]   ;;  %v2515_v47 = vld [vmem:[%s3377_s1 + $0x17c] ss:$44 sps:$4 sm:$0xff]   ;;  %v2513_v49 = vld [vmem:[%s3377_s1 + $0x178] ss:$44 sps:$4 sm:$0xff]  }
  0x11   :  { %v2510_v48 = vld [vmem:[%s3377_s1 + $0x170] ss:$44 sps:$4 sm:$0xff]   ;;  %v2516_v52 = vld [vmem:[%s3377_s1 + $0x118] ss:$44 sps:$4 sm:$0xff]   ;;  %v2519_v53 = vld [vmem:[%s3377_s1 + $0x120] ss:$44 sps:$4 sm:$0xff]  }
  0x12   :  { %v2518_v50 = vld [vmem:[%s3377_s1 + $0x11c] ss:$44 sps:$4 sm:$0xff]   ;;  %v2521_v51 = vld [vmem:[%s3377_s1 + $0x124] ss:$44 sps:$4 sm:$0xff]   ;;  %v2527_v55 = vld [vmem:[%s3377_s1 + $0xcc] ss:$44 sps:$4 sm:$0xff]  }
  0x13   :  { %640 = vmatpush1.bf16.msra.mxu0 %v2472_v19  ;;  %681 = vmatpush1.bf16.msra.mxu1 %v2473_v20  ;;  %v2524_v54 = vld [vmem:[%s3377_s1 + $0xc4] ss:$44 sps:$4 sm:$0xff]   ;;  %v2522_v56 = vld [vmem:[%s3377_s1 + $0xc0] ss:$44 sps:$4 sm:$0xff]   ;;  %v2525_v57 = vld [vmem:[%s3377_s1 + $0xc8] ss:$44 sps:$4 sm:$0xff]  }
  0x14   :  { %641 = vmatprep.subr.bf16.mxu0 %v2474_v21  ;;  %682 = vmatprep.subr.bf16.mxu1 %v2476_v22  ;;  %v2530_v58 = vld [vmem:[%s3377_s1 + $0x6c] ss:$44 sps:$4 sm:$0xff]   ;;  %v2533_v59 = vld [vmem:[%s3377_s1 + $0x74] ss:$44 sps:$4 sm:$0xff]   ;;  %v2531_v61 = vld [vmem:[%s3377_s1 + $0x70] ss:$44 sps:$4 sm:$0xff]  }
  0x15   :  { %v2528_v60 = vld [vmem:[%s3377_s1 + $0x68] ss:$44 sps:$4 sm:$0xff]   ;;  %v2534_v0 = vld [vmem:[%s3377_s1 + $0x10] ss:$44 sps:$4 sm:$0xff]   ;;  %v2537_v2 = vld [vmem:[%s3377_s1 + $0x18] ss:$44 sps:$4 sm:$0xff]  }
  0x16   :  { %v2536_v62 = vld [vmem:[%s3377_s1 + $0x14] ss:$44 sps:$4 sm:$0xff]   ;;  %v2539_v63 = vld [vmem:[%s3377_s1 + $0x1c] ss:$44 sps:$4 sm:$0xff]   ;;  %v2542_v3 = vld [vmem:[%s3377_s1 + $0x28c] ss:$44 sps:$4 sm:$0xff]  }
  0x17   :  { %642 = vmatpush1.bf16.msra.mxu0 %v2478_v23  ;;  %683 = vmatpush1.bf16.msra.mxu1 %v2479_v24  ;;  %v2540_v4 = vld [vmem:[%s3377_s1 + $0x288] ss:$44 sps:$4 sm:$0xff]   ;;  %v2546_v5 = vld [vmem:[%s3377_s1 + $0x290] ss:$44 sps:$4 sm:$0xff]   ;;  %v2658_v6 = vmov 0.0  }
  0x18   :  { %643 = vmatprep.subr.bf16.mxu0 %v2480_v25  ;;  %684 = vmatprep.subr.bf16.mxu1 %v2482_v26  ;;  %v2545_v7 = vld [vmem:[%s3377_s1 + $0x234] ss:$44 sps:$4 sm:$0xff]   ;;  %v2543_v8 = vld [vmem:[%s3377_s1 + $0x230] ss:$44 sps:$4 sm:$0xff]   ;;  %v2550_v9 = vld [vmem:[%s3377_s1 + $0x238] ss:$44 sps:$4 sm:$0xff]  }
  0x19   :  { %v2549_v10 = vld [vmem:[%s3377_s1 + $0x1dc] ss:$44 sps:$4 sm:$0xff]   ;;  %v2547_v11 = vld [vmem:[%s3377_s1 + $0x1d8] ss:$44 sps:$4 sm:$0xff]   ;;  %v2554_v12 = vld [vmem:[%s3377_s1 + $0x1e0] ss:$44 sps:$4 sm:$0xff]  }
  0x1a   :  { %v2551_v13 = vld [vmem:[%s3377_s1 + $0x180] ss:$44 sps:$4 sm:$0xff]   ;;  %v2558_v14 = vld [vmem:[%s3377_s1 + $0x188] ss:$44 sps:$4 sm:$0xff]   ;;  %v2562_v17 = vld [vmem:[%s3377_s1 + $0x130] ss:$44 sps:$4 sm:$0xff]  }
  0x1b   :  { %644 = vmatpush1.bf16.msra.mxu0 %v2484_v27  ;;  %685 = vmatpush1.bf16.msra.mxu1 %v2485_v28  ;;  %v2557_v15 = vld [vmem:[%s3377_s1 + $0x12c] ss:$44 sps:$4 sm:$0xff]   ;;  %v2555_v16 = vld [vmem:[%s3377_s1 + $0x128] ss:$44 sps:$4 sm:$0xff]   ;;  %v2559_v19 = vld [vmem:[%s3377_s1 + $0xd0] ss:$44 sps:$4 sm:$0xff]  }
  0x1c   :  { %645 = vmatprep.subr.bf16.mxu0 %v2486_v29  ;;  %686 = vmatprep.subr.bf16.mxu1 %v2488_v30  ;;  %v2561_v18 = vld [vmem:[%s3377_s1 + $0xd4] ss:$44 sps:$4 sm:$0xff]   ;;  %v2566_v20 = vld [vmem:[%s3377_s1 + $0xd8] ss:$44 sps:$4 sm:$0xff]   ;;  %v2565_v21 = vld [vmem:[%s3377_s1 + $0x7c] ss:$44 sps:$4 sm:$0xff]  }
  0x1d   :  { %v2563_v22 = vld [vmem:[%s3377_s1 + $0x78] ss:$44 sps:$4 sm:$0xff]   ;;  %v2570_v23 = vld [vmem:[%s3377_s1 + $0x80] ss:$44 sps:$4 sm:$0xff]   ;;  %v2571_v26 = vld [vmem:[%s3377_s1 + $0x28] ss:$44 sps:$4 sm:$0xff]  }
  0x1e   :  { %v2569_v24 = vld [vmem:[%s3377_s1 + $0x24] ss:$44 sps:$4 sm:$0xff]   ;;  %v2567_v25 = vld [vmem:[%s3377_s1 + $0x20] ss:$44 sps:$4 sm:$0xff]   ;;  %v2572_v27 = vld [vmem:[%s3379_s3 + $0x78] sm:$0xff]  }
  0x1f   :  { %646 = vmatpush1.bf16.msra.mxu0 %v2490_v31  ;;  %687 = vmatpush1.bf16.msra.mxu1 %v2491_v32  ;;  %v2573_v28 = vld [vmem:[%s3379_s3 + $0xf8] sm:$0xff]   ;;  %v2576_v31 = vld [vmem:[%s3379_s3 + $0x70] sm:$0xff]  }
  0x20   :  { %713 = vmatprep.subr.bf16.mxu0 %v2494_v33  ;;  %754 = vmatprep.subr.bf16.mxu1 %v2497_v34  ;;  %v2574_v29 = vld [vmem:[%s3379_s3 + $0x38] sm:$0xff]   ;;  %v2577_v32 = vld [vmem:[%s3379_s3 + $0xf0] sm:$0xff]  }
  0x21   :  { %v2575_v30 = vld [vmem:[%s3379_s3 + $0xb8] sm:$0xff]   ;;  %v2578_v33 = vld [vmem:[%s3379_s3 + $0x30] sm:$0xff]  }
  0x22   :  { %664 = vmatmul.mubr.bf16.vlgmr.msra.gmra.mxu0 %v2807_v35  ;;  %705 = vmatmul.mubr.bf16.vlgmr.msra.gmra.mxu1 %v2807_v35  ;;  %v2579_v34 = vld [vmem:[%s3379_s3 + $0xb0] sm:$0xff]  }
  0x23   :  { %714 = vmatpush1.bf16.msra.mxu0 %v2492_v36  ;;  %755 = vmatpush1.bf16.msra.mxu1 %v2495_v37  ;;  %v2580_v36 = vld [vmem:[%s3379_s3 + $0x68] sm:$0xff]  }
  0x24   :  { %715 = vmatprep.subr.bf16.mxu0 %v2500_v38  ;;  %756 = vmatprep.subr.bf16.mxu1 %v2503_v39  ;;  %v2581_v37 = vld [vmem:[%s3379_s3 + $0xe8] sm:$0xff]   ;;  %v2584_v39 = vld [vmem:[%s3379_s3 + $0x60] sm:$0xff]  }
  0x25   :  { %745 = vmatprep.mubr.bf16.mxu0 %v2657_v1  ;;  %786 = vmatprep.mubr.bf16.mxu1 %v2657_v1  ;;  %v2583_v38 = vld [vmem:[%s3379_s3 + $0xa8] sm:$0xff]  }
  0x27   :  { %716 = vmatpush1.bf16.msra.mxu0 %v2498_v40  ;;  %757 = vmatpush1.bf16.msra.mxu1 %v2501_v41  ;;  %v2585_v40 = vld [vmem:[%s3379_s3 + $0xe0] sm:$0xff]  }
  0x28   :  { %717 = vmatprep.subr.bf16.mxu0 %v2506_v42  ;;  %758 = vmatprep.subr.bf16.mxu1 %v2509_v43  ;;  %v2586_v41 = vld [vmem:[%s3379_s3 + $0x20] sm:$0xff]   ;;  %v2588_v43 = vld [vmem:[%s3379_s3 + $0x58] sm:$0xff]  }
  0x29   :  { %v2587_v42 = vld [vmem:[%s3379_s3 + $0xa0] sm:$0xff]  }
  0x2b   :  { %718 = vmatpush1.bf16.msra.mxu0 %v2504_v44  ;;  %759 = vmatpush1.bf16.msra.mxu1 %v2507_v45  ;;  %v2589_v44 = vld [vmem:[%s3379_s3 + $0xd8] sm:$0xff]  }
  0x2c   :  { %719 = vmatprep.subr.bf16.mxu0 %v2512_v46  ;;  %760 = vmatprep.subr.bf16.mxu1 %v2515_v47  ;;  %v2590_v45 = vld [vmem:[%s3379_s3 + $0x18] sm:$0xff]   ;;  %v2592_v47 = vld [vmem:[%s3379_s3 + $0x50] sm:$0xff]  }
  0x2d   :  { %v2591_v46 = vld [vmem:[%s3379_s3 + $0x98] sm:$0xff]  }
  0x2f   :  { %720 = vmatpush1.bf16.msra.mxu0 %v2510_v48  ;;  %761 = vmatpush1.bf16.msra.mxu1 %v2513_v49  ;;  %v2593_v48 = vld [vmem:[%s3379_s3 + $0xd0] sm:$0xff]  }
  0x30   :  { %721 = vmatprep.subr.bf16.mxu0 %v2518_v50  ;;  %762 = vmatprep.subr.bf16.mxu1 %v2521_v51  ;;  %v2594_v49 = vld [vmem:[%s3379_s3 + $0x10] sm:$0xff]   ;;  %v2596_v51 = vld [vmem:[%s3379_s3 + $0x48] sm:$0xff]  }
  0x31   :  { %v2595_v50 = vld [vmem:[%s3379_s3 + $0x90] sm:$0xff]  }
  0x33   :  { %722 = vmatpush1.bf16.msra.mxu0 %v2516_v52  ;;  %763 = vmatpush1.bf16.msra.mxu1 %v2519_v53  ;;  %v2597_v52 = vld [vmem:[%s3379_s3 + $0xc8] sm:$0xff]  }
  0x34   :  { %723 = vmatprep.subr.bf16.mxu0 %v2524_v54  ;;  %764 = vmatprep.subr.bf16.mxu1 %v2527_v55  ;;  %v2598_v53 = vld [vmem:[%s3379_s3 + $0x8] sm:$0xff]   ;;  %v2600_v55 = vld [vmem:[%s3379_s3 + $0x40] sm:$0xff]  }
  0x35   :  { %v2599_v54 = vld [vmem:[%s3379_s3 + $0x88] sm:$0xff]  }
  0x37   :  { %724 = vmatpush1.bf16.msra.mxu0 %v2522_v56  ;;  %765 = vmatpush1.bf16.msra.mxu1 %v2525_v57  ;;  %v2601_v56 = vld [vmem:[%s3379_s3 + $0xc0] sm:$0xff]  }
  0x38   :  { %725 = vmatprep.subr.bf16.mxu0 %v2530_v58  ;;  %766 = vmatprep.subr.bf16.mxu1 %v2533_v59  ;;  %v2602_v57 = vld [vmem:[%s3379_s3] sm:$0xff]   ;;  %v2604_v59 = vld [vmem:[%s3379_s3 + $0x178] sm:$0xff]  }
  0x39   :  { %v2603_v58 = vld [vmem:[%s3379_s3 + $0x80] sm:$0xff]  }
  0x3b   :  { %726 = vmatpush1.bf16.msra.mxu0 %v2528_v60  ;;  %767 = vmatpush1.bf16.msra.mxu1 %v2531_v61  ;;  %v2606_v60 = vld [vmem:[%s3379_s3 + $0x1f8] sm:$0xff]   ;;  %v128_v61 = vlaneseq }
  0x3c   :  { %727 = vmatprep.subr.bf16.mxu0 %v2536_v62  ;;  %768 = vmatprep.subr.bf16.mxu1 %v2539_v63 }
  0x3d   :  { %v3092_v62 = vshrl.u32 %v128_v61, 7  ;;  %v2629_v61 = vld [vmem:[%s3379_s3 + $0x108] sm:$0xff]  }
  0x3f   :  { %728 = vmatpush1.bf16.msra.mxu0 %v2534_v0  ;;  %769 = vmatpush1.bf16.msra.mxu1 %v2537_v2  ;;  %v3095_v63 = vsub.s32 0, %v3092_v62  ;;  %v138_v0 = vsub.s32 2, %v3092_v62  ;;  %v3101_v2 = vld [vmem:[%s3380_s2] sm:$0xff] }
  0x40   :  { %795 = vmatprep.subr.bf16.mxu0 %v2542_v3  ;;  %2341 = vmatprep.subr.bf16.mxu1 %v2658_v6  ;;  %v134_v3 = vsub.s32 1, %v3092_v62 }
  0x42   :  { %746 = vmatmul.mubr.bf16.vlgmr.msra.gmra.mxu0 %v2807_v35  ;;  %787 = vmatmul.mubr.bf16.vlgmr.msra.gmra.mxu1 %v2807_v35 }
  0x43   :  { %796 = vmatpush1.bf16.msra.mxu0 %v2540_v4  ;;  %2342 = vmatpush3.bf16.msra.mxu1 %v2546_v5  ;;  %v142_v4 = vsub.s32 3, %v3092_v62  ;;  %v131_v5 = vrot.slane %v3101_v2, %v3095_v63 }
  0x44   :  { %797 = vmatprep.subr.bf16.mxu0 %v2545_v7  ;;  %2343 = vmatprep.subr.bf16.mxu1 %v2658_v6  ;;  %v139_v7 = vrot.slane %v3101_v2, %v138_v0 }
  0x45   :  { %827 = vmatprep.mubr.bf16.mxu0 %v2657_v1  ;;  %2357 = vmatprep.mubr.msk.bf16.mxu1 %vm2659_vm0, %v2658_v6  ;;  %v2553_v1 = vld [vmem:[%s3377_s1 + $0x184] ss:$44 sps:$4 sm:$0xff]  }
  0x47   :  { %798 = vmatpush1.bf16.msra.mxu0 %v2543_v8  ;;  %2344 = vmatpush3.bf16.msra.mxu1 %v2550_v9  ;;  %v135_v8 = vrot.slane %v3101_v2, %v134_v3  ;;  %v143_v9 = vrot.slane %v3101_v2, %v142_v4  ;;  %v2631_v4 = vld [vmem:[%s3379_s3 + $0x188] sm:$0xff]  }
  0x48   :  { %799 = vmatprep.subr.bf16.mxu0 %v2549_v10  ;;  %2345 = vmatprep.subr.bf16.mxu1 %v2658_v6 }
  0x4b   :  { %800 = vmatpush1.bf16.msra.mxu0 %v2547_v11  ;;  %2346 = vmatpush3.bf16.msra.mxu1 %v2554_v12 }
  0x4c   :  { %801 = vmatprep.subr.bf16.mxu0 %v2553_v1  ;;  %2347 = vmatprep.subr.bf16.mxu1 %v2658_v6 }
  0x4f   :  { %802 = vmatpush1.bf16.msra.mxu0 %v2551_v13  ;;  %2348 = vmatpush3.bf16.msra.mxu1 %v2558_v14 }
  0x50   :  { %803 = vmatprep.subr.bf16.mxu0 %v2557_v15  ;;  %2349 = vmatprep.subr.bf16.mxu1 %v2658_v6 }
  0x53   :  { %804 = vmatpush1.bf16.msra.mxu0 %v2555_v16  ;;  %2350 = vmatpush3.bf16.msra.mxu1 %v2562_v17 }
  0x54   :  { %805 = vmatprep.subr.bf16.mxu0 %v2561_v18  ;;  %2351 = vmatprep.subr.bf16.mxu1 %v2658_v6 }
  0x57   :  { %806 = vmatpush1.bf16.msra.mxu0 %v2559_v19  ;;  %2352 = vmatpush3.bf16.msra.mxu1 %v2566_v20 }
  0x58   :  { %807 = vmatprep.subr.bf16.mxu0 %v2565_v21  ;;  %2353 = vmatprep.subr.bf16.mxu1 %v2658_v6 }
  0x5b   :  { %808 = vmatpush1.bf16.msra.mxu0 %v2563_v22  ;;  %2354 = vmatpush3.bf16.msra.mxu1 %v2570_v23 }
  0x5c   :  { %809 = vmatprep.subr.bf16.mxu0 %v2569_v24  ;;  %2355 = vmatprep.subr.bf16.mxu1 %v2658_v6 }
  0x5f   :  { %810 = vmatpush1.bf16.msra.mxu0 %v2567_v25  ;;  %2356 = vmatpush3.bf16.msra.mxu1 %v2571_v26 }
  0x60   :  { %2193 = vmatprep.subr.bf16.mxu0 %v2572_v27  ;;  %2215 = vmatprep.subr.bf16.mxu1 %v2573_v28  ;;  %v2605_v28 = vld [vmem:[%s3379_s3 + $0x138] sm:$0xff]  }
  0x62   :  { %828 = vmatmul.mubr.bf16.vlgmr.msra.gmra.mxu0 %v2807_v35  ;;  %2358 = vmatmul.mubr.bf16.vlgmr.msra.gmra.mxu1 %v2807_v35  ;;  %v2582_v35 = vld [vmem:[%s3379_s3 + $0x28] sm:$0xff]  }
  0x63   :  { %2194 = vmatpush3.bf16.msra.mxu0 %v2574_v29  ;;  %2216 = vmatpush3.bf16.msra.mxu1 %v2575_v30  ;;  %v2607_v29 = vld [vmem:[%s3379_s3 + $0x1b8] sm:$0xff]  }
  0x64   :  { %2195 = vmatprep.subr.bf16.mxu0 %v2576_v31  ;;  %2217 = vmatprep.subr.bf16.mxu1 %v2577_v32  ;;  %v2608_v31 = vld [vmem:[%s3379_s3 + $0x170] sm:$0xff]  }
  0x65   :  { %v2610_v32 = vld [vmem:[%s3379_s3 + $0x1f0] sm:$0xff]  }
  0x67   :  { %2196 = vmatpush3.bf16.msra.mxu0 %v2578_v33  ;;  %2218 = vmatpush3.bf16.msra.mxu1 %v2579_v34  ;;  %v2609_v33 = vld [vmem:[%s3379_s3 + $0x130] sm:$0xff]  }
  0x68   :  { %2197 = vmatprep.subr.bf16.mxu0 %v2580_v36  ;;  %2219 = vmatprep.subr.bf16.mxu1 %v2581_v37  ;;  %v2611_v34 = vld [vmem:[%s3379_s3 + $0x1b0] sm:$0xff]   ;;  %v2612_v36 = vld [vmem:[%s3379_s3 + $0x168] sm:$0xff]  }
  0x69   :  { %v2614_v37 = vld [vmem:[%s3379_s3 + $0x1e8] sm:$0xff]  }
  0x6b   :  { %2198 = vmatpush3.bf16.msra.mxu0 %v2582_v35  ;;  %2220 = vmatpush3.bf16.msra.mxu1 %v2583_v38  ;;  %v2613_v35 = vld [vmem:[%s3379_s3 + $0x128] sm:$0xff]  }
  0x6c   :  { %2199 = vmatprep.subr.bf16.mxu0 %v2584_v39  ;;  %2221 = vmatprep.subr.bf16.mxu1 %v2585_v40  ;;  %v2615_v38 = vld [vmem:[%s3379_s3 + $0x1a8] sm:$0xff]   ;;  %v2616_v39 = vld [vmem:[%s3379_s3 + $0x160] sm:$0xff]  }
  0x6d   :  { %v2618_v40 = vld [vmem:[%s3379_s3 + $0x1e0] sm:$0xff]  }
  0x6f   :  { %2200 = vmatpush3.bf16.msra.mxu0 %v2586_v41  ;;  %2222 = vmatpush3.bf16.msra.mxu1 %v2587_v42  ;;  %v2617_v41 = vld [vmem:[%s3379_s3 + $0x120] sm:$0xff]  }
  0x70   :  { %2201 = vmatprep.subr.bf16.mxu0 %v2588_v43  ;;  %2223 = vmatprep.subr.bf16.mxu1 %v2589_v44  ;;  %v2619_v42 = vld [vmem:[%s3379_s3 + $0x1a0] sm:$0xff]   ;;  %v2620_v43 = vld [vmem:[%s3379_s3 + $0x158] sm:$0xff]  }
  0x71   :  { %v2622_v44 = vld [vmem:[%s3379_s3 + $0x1d8] sm:$0xff]  }
  0x73   :  { %2202 = vmatpush3.bf16.msra.mxu0 %v2590_v45  ;;  %2224 = vmatpush3.bf16.msra.mxu1 %v2591_v46  ;;  %v2621_v45 = vld [vmem:[%s3379_s3 + $0x118] sm:$0xff]  }
  0x74   :  { %2203 = vmatprep.subr.bf16.mxu0 %v2592_v47  ;;  %2225 = vmatprep.subr.bf16.mxu1 %v2593_v48  ;;  %v2623_v46 = vld [vmem:[%s3379_s3 + $0x198] sm:$0xff]   ;;  %v2624_v47 = vld [vmem:[%s3379_s3 + $0x150] sm:$0xff]  }
  0x75   :  { %v2626_v48 = vld [vmem:[%s3379_s3 + $0x1d0] sm:$0xff]  }
  0x77   :  { %2204 = vmatpush3.bf16.msra.mxu0 %v2594_v49  ;;  %2226 = vmatpush3.bf16.msra.mxu1 %v2595_v50  ;;  %v146_v49 = vsub.s32 4, %v3092_v62  ;;  %v154_v50 = vsub.s32 6, %v3092_v62 }
  0x78   :  { %2205 = vmatprep.subr.bf16.mxu0 %v2596_v51  ;;  %2227 = vmatprep.subr.bf16.mxu1 %v2597_v52  ;;  %v2625_v51 = vld [vmem:[%s3379_s3 + $0x110] sm:$0xff]  }
  0x79   :  { %v2627_v52 = vld [vmem:[%s3379_s3 + $0x190] sm:$0xff]  }
  0x7b   :  { %2206 = vmatpush3.bf16.msra.mxu0 %v2598_v53  ;;  %2228 = vmatpush3.bf16.msra.mxu1 %v2599_v54  ;;  %v150_v53 = vsub.s32 5, %v3092_v62  ;;  %v158_v54 = vsub.s32 7, %v3092_v62  ;;  %v2653_v62 = vld [vmem:[%s3379_s3 + $0x200] sm:$0xff]  }
  0x7c   :  { %2207 = vmatprep.subr.bf16.mxu0 %v2600_v55  ;;  %2229 = vmatprep.subr.bf16.mxu1 %v2601_v56  ;;  %v2628_v55 = vld [vmem:[%s3379_s3 + $0x148] sm:$0xff]  }
  0x7d   :  { %v2630_v56 = vld [vmem:[%s3379_s3 + $0x1c8] sm:$0xff]  }
  0x7f   :  { %2208 = vmatpush3.bf16.msra.mxu0 %v2602_v57  ;;  %2230 = vmatpush3.bf16.msra.mxu1 %v2603_v58  ;;  %v147_v57 = vrot.slane %v3101_v2, %v146_v49  ;;  %v155_v58 = vrot.slane %v3101_v2, %v154_v50  ;;  %v2650_v49 = vld [vmem:[%s3379_s3 + $0x208] sm:$0xff]  }
  0x80   :  { %2237 = vmatprep.subr.bf16.mxu0 %v2604_v59  ;;  %2259 = vmatprep.subr.bf16.mxu1 %v2606_v60  ;;  %v151_v59 = vrot.slane %v3101_v2, %v150_v53  ;;  %v159_v60 = vrot.slane %v3101_v2, %v158_v54  ;;  %v2634_v2 = vld [vmem:[%s3379_s3 + $0x1c0] sm:$0xff]  }
  0xe2   :  { %v665_v10 = vpop.f32.mrf.mxu0  ;;  %v706_v11 = vpop.f32.mrf.mxu1 }
  0xe3   :  { %v666_v12 = vadd.f32 %v665_v10, %v131_v5  ;;  %v707_v1 = vadd.f32 %v706_v11, %v139_v7 }
  0xe4   :  { %v667_v13 = vpop.f32.mrf.mxu0  ;;  %v708_v14 = vpop.f32.mrf.mxu1 }
  0xe5   :  { %v878_v15 = vmax.f32 %v707_v1, 0.0  ;;  %v668_v16 = vadd.f32 %v667_v13, %v135_v8  ;;  %v709_v17 = vadd.f32 %v708_v14, %v143_v9  ;;  %v876_v18 = vmax.f32 %v666_v12, 0.0  ;;  %v2632_v8 = vld [vmem:[%s3379_s3 + $0x140] sm:$0xff]  }
  0xe6   :  { %v669_v19 = vpop.f32.mrf.mxu0  ;;  %v710_v20 = vpop.f32.mrf.mxu1 }
  0xe7   :  { %v877_v21 = vmax.f32 %v668_v16, 0.0  ;;  %v879_v22 = vmax.f32 %v709_v17, 0.0  ;;  %v889_v23 = vpack.c.bf16 %v878_v15, %v878_v15  ;;  %v887_v30 = vpack.c.bf16 %v876_v18, %v876_v18  ;;  %v2633_v15 = vld [vmem:[%s3379_s3 + $0x100] sm:$0xff]   ;;  %v2636_v20 = vld [vmem:[%s3379_s3 + $0x278] sm:$0xff]  }
  0xe8   :  { %v670_v24 = vpop.f32.mrf.mxu0  ;;  %v711_v25 = vpop.f32.mrf.mxu1  ;;  %v2635_v16 = vld [vmem:[%s3379_s3 + $0x180] sm:$0xff]  }
  0xe9   :  { %v888_v26 = vpack.c.bf16 %v877_v21, %v877_v21  ;;  %v890_v27 = vpack.c.bf16 %v879_v22, %v879_v22  ;;  %v2648_v21 = vld [vmem:[%s3379_s3 + $0x290] sm:$0x3f]  }
  0xeb   :  { %1601 = vmatprep.mubr.bf16.mxu0 %v888_v26  ;;  %1641 = vmatprep.mubr.bf16.mxu1 %v890_v27 }
  0xec   :  { %1602 = vmatmul.mubr.bf16.vlgmr.msra.gmra.mxu0 %v887_v30  ;;  %1642 = vmatmul.mubr.bf16.vlgmr.msra.gmra.mxu1 %v889_v23 }
  0xed   :  { %2238 = vmatpush3.bf16.msra.mxu0 %v2605_v28  ;;  %2260 = vmatpush3.bf16.msra.mxu1 %v2607_v29  ;;  %v2637_v29 = vld [vmem:[%s3379_s3 + $0x238] sm:$0xff]  }
  0xee   :  { %2239 = vmatprep.subr.bf16.mxu0 %v2608_v31  ;;  %2261 = vmatprep.subr.bf16.mxu1 %v2610_v32  ;;  %v2638_v31 = vld [vmem:[%s3379_s3 + $0x270] sm:$0xff]   ;;  %v1567_v32 = vsel %vm1565_vm1, %v2648_v21, 0  ;;  %v1827_v21 = vld [vmem:[%s3381_s4 + $0x8] sm:$0xff] }
  0xf1   :  { %2240 = vmatpush3.bf16.msra.mxu0 %v2609_v33  ;;  %2262 = vmatpush3.bf16.msra.mxu1 %v2611_v34  ;;  %v2639_v33 = vld [vmem:[%s3379_s3 + $0x230] sm:$0xff]   ;;  %v2651_v34 = vld [vmem:[%s3379_s3 + $0x288] sm:$0xff]  }
  0xf2   :  { %2241 = vmatprep.subr.bf16.mxu0 %v2612_v36  ;;  %2263 = vmatprep.subr.bf16.mxu1 %v2614_v37  ;;  %v2640_v36 = vld [vmem:[%s3379_s3 + $0x268] sm:$0xff]  }
  0xf3   :  { %v2641_v37 = vld [vmem:[%s3379_s3 + $0x228] sm:$0xff]  }
  0xf5   :  { %2242 = vmatpush3.bf16.msra.mxu0 %v2613_v35  ;;  %2264 = vmatpush3.bf16.msra.mxu1 %v2615_v38  ;;  %v2654_v35 = vld [vmem:[%s3379_s3 + $0x280] sm:$0xff]  }
  0xf6   :  { %2243 = vmatprep.subr.bf16.mxu0 %v2616_v39  ;;  %2265 = vmatprep.subr.bf16.mxu1 %v2618_v40  ;;  %v2642_v38 = vld [vmem:[%s3379_s3 + $0x260] sm:$0xff]   ;;  %v2644_v40 = vld [vmem:[%s3379_s3 + $0x258] sm:$0xff]  }
  0xf7   :  { %v2643_v39 = vld [vmem:[%s3379_s3 + $0x220] sm:$0xff]  }
  0xf9   :  { %2244 = vmatpush3.bf16.msra.mxu0 %v2617_v41  ;;  %2266 = vmatpush3.bf16.msra.mxu1 %v2619_v42  ;;  %v2645_v41 = vld [vmem:[%s3379_s3 + $0x218] sm:$0xff]   ;;  %v2646_v42 = vld [vmem:[%s3379_s3 + $0x250] sm:$0xff]  }
  0xfa   :  { %2245 = vmatprep.subr.bf16.mxu0 %v2620_v43  ;;  %2267 = vmatprep.subr.bf16.mxu1 %v2622_v44  ;;  %v125_v43 = vld [vmem:[%s3380_s2 + $0x8] sm:$0x7]  ;;  %v2647_v44 = vld [vmem:[%s3379_s3 + $0x210] sm:$0xff]  }
  0xfd   :  { %2246 = vmatpush3.bf16.msra.mxu0 %v2621_v45  ;;  %2268 = vmatpush3.bf16.msra.mxu1 %v2623_v46  ;;  %v2649_v45 = vld [vmem:[%s3379_s3 + $0x248] sm:$0xff]   ;;  %v163_v46 = vrot.slane %v125_v43, %v3095_v63 }
  0xfe   :  { %2247 = vmatprep.subr.bf16.mxu0 %v2624_v47  ;;  %2269 = vmatprep.subr.bf16.mxu1 %v2626_v48  ;;  %v171_v47 = vrot.slane %v125_v43, %v138_v0  ;;  %v167_v48 = vrot.slane %v125_v43, %v134_v3 }
 0x101   :  { %2248 = vmatpush3.bf16.msra.mxu0 %v2625_v51  ;;  %2270 = vmatpush3.bf16.msra.mxu1 %v2627_v52  ;;  %v2652_v52 = vld [vmem:[%s3379_s3 + $0x240] sm:$0xff]  }
 0x102   :  { %v747_v5 = vpop.f32.mrf.mxu0  ;;  %v788_v7 = vpop.f32.mrf.mxu1  ;;  %2249 = vmatprep.subr.bf16.mxu0 %v2628_v55  ;;  %2271 = vmatprep.subr.bf16.mxu1 %v2630_v56 }
 0x103   :  { %v748_v9 = vadd.f32 %v747_v5, %v147_v57  ;;  %v789_v10 = vadd.f32 %v788_v7, %v155_v58 }
 0x104   :  { %v749_v11 = vpop.f32.mrf.mxu0  ;;  %v790_v12 = vpop.f32.mrf.mxu1 }
 0x105   :  { %v882_v1 = vmax.f32 %v789_v10, 0.0  ;;  %v750_v13 = vadd.f32 %v749_v11, %v151_v59  ;;  %v791_v14 = vadd.f32 %v790_v12, %v159_v60  ;;  %2250 = vmatpush3.bf16.msra.mxu0 %v2629_v61  ;;  %2272 = vmatpush3.bf16.msra.mxu1 %v2631_v4  ;;  %v880_v17 = vmax.f32 %v748_v9, 0.0  ;;  %v1840_v9 = vld [vmem:[%s3381_s4 + $0x70] sm:$0xff]  ;;  %v1839_v10 = vld [vmem:[%s3381_s4 + $0x68] sm:$0xff]  ;;  %v1838_v11 = vld [vmem:[%s3381_s4 + $0x60] sm:$0xff] }
 0x106   :  { %v751_v18 = vpop.f32.mrf.mxu0  ;;  %2251 = vmatprep.subr.bf16.mxu0 %v2632_v8  ;;  %2273 = vmatprep.subr.bf16.mxu1 %v2634_v2  ;;  %v792_v19 = vpop.f32.mrf.mxu1  ;;  %v1841_v2 = vld [vmem:[%s3381_s4 + $0x78] sm:$0xff] }
 0x107   :  { %v881_v22 = vmax.f32 %v750_v13, 0.0  ;;  %v883_v23 = vmax.f32 %v791_v14, 0.0  ;;  %v893_v24 = vpack.c.bf16 %v882_v1, %v882_v1  ;;  %v891_v30 = vpack.c.bf16 %v880_v17, %v880_v17  ;;  %v1837_v12 = vld [vmem:[%s3381_s4 + $0x58] sm:$0xff]  ;;  %v1836_v1 = vld [vmem:[%s3381_s4 + $0x50] sm:$0xff]  ;;  %v1835_v13 = vld [vmem:[%s3381_s4 + $0x48] sm:$0xff] }
 0x108   :  { %v752_v25 = vpop.f32.mrf.mxu0  ;;  %v793_v26 = vpop.f32.mrf.mxu1  ;;  %v1834_v14 = vld [vmem:[%s3381_s4 + $0x40] sm:$0xff]  ;;  %v1831_v17 = vld [vmem:[%s3381_s4 + $0x28] sm:$0xff]  ;;  %v1829_v19 = vld [vmem:[%s3381_s4 + $0x18] sm:$0xff] }
 0x109   :  { %v892_v27 = vpack.c.bf16 %v881_v22, %v881_v22  ;;  %v894_v28 = vpack.c.bf16 %v883_v23, %v883_v23  ;;  %2252 = vmatpush3.bf16.msra.mxu0 %v2633_v15  ;;  %2274 = vmatpush3.bf16.msra.mxu1 %v2635_v16  ;;  %v1833_v15 = vld [vmem:[%s3381_s4 + $0x38] sm:$0xff]  ;;  %v1832_v16 = vld [vmem:[%s3381_s4 + $0x30] sm:$0xff]  ;;  %v1830_v18 = vld [vmem:[%s3381_s4 + $0x20] sm:$0xff] }
 0x10a   :  { %2281 = vmatprep.subr.bf16.mxu0 %v2636_v20  ;;  %2361 = vmatprep.subr.bf16.mxu1 %v2658_v6  ;;  %v1828_v20 = vld [vmem:[%s3381_s4 + $0x10] sm:$0xff]  ;;  %v1826_v22 = vld [vmem:[%s3381_s4] sm:$0xff] }
 0x10b   :  { %1681 = vmatprep.mubr.bf16.mxu0 %v892_v27  ;;  %1721 = vmatprep.mubr.bf16.mxu1 %v894_v28 }
 0x10c   :  { %1682 = vmatmul.mubr.bf16.vlgmr.msra.gmra.mxu0 %v891_v30  ;;  %1722 = vmatmul.mubr.bf16.vlgmr.msra.gmra.mxu1 %v893_v24 }
 0x10d   :  { %2282 = vmatpush3.bf16.msra.mxu0 %v2637_v29  ;;  %2362 = vmatpush3.bf16.msra.mxu1 %v1567_v32 }
 0x10e   :  { %2283 = vmatprep.subr.bf16.mxu0 %v2638_v31  ;;  %2363 = vmatprep.subr.bf16.mxu1 %v2658_v6 }
 0x10f   :  { %2367 = vmatprep.mubr.msk.bf16.mxu1 %vm2659_vm0, %v2658_v6 }
 0x111   :  { %2284 = vmatpush3.bf16.msra.mxu0 %v2639_v33  ;;  %2364 = vmatpush3.bf16.msra.mxu1 %v2651_v34 }
 0x112   :  { %2285 = vmatprep.subr.bf16.mxu0 %v2640_v36  ;;  %2365 = vmatprep.subr.bf16.mxu1 %v2658_v6 }
 0x115   :  { %2286 = vmatpush3.bf16.msra.mxu0 %v2641_v37  ;;  %2366 = vmatpush3.bf16.msra.mxu1 %v2654_v35 }
 0x116   :  { %2287 = vmatprep.subr.bf16.mxu0 %v2642_v38  ;;  %2371 = vmatprep.subr.mxu1 %v2658_v6 }
 0x119   :  { %2288 = vmatpush3.bf16.msra.mxu0 %v2643_v39 }
 0x11a   :  { %2289 = vmatprep.subr.bf16.mxu0 %v2644_v40 }
 0x11d   :  { %2290 = vmatpush3.bf16.msra.mxu0 %v2645_v41 }
 0x11e   :  { %2291 = vmatprep.subr.bf16.mxu0 %v2646_v42 }
 0x121   :  { %2292 = vmatpush3.bf16.msra.mxu0 %v2647_v44 }
 0x122   :  { %v829_v50 = vpop.f32.mrf.mxu0  ;;  %2293 = vmatprep.subr.bf16.mxu0 %v2649_v45  ;;  %v870_v51 = vpop.f32.mrf.mxu1 }
 0x123   :  { %v830_v53 = vadd.f32 %v829_v50, %v163_v46  ;;  %v871_v54 = vadd.f32 %v870_v51, %v171_v47 }
 0x124   :  { %v831_v55 = vpop.f32.mrf.mxu0  ;;  %v2359_v56 = vpop.f32.mrf.mxu1 }
 0x125   :  { %v832_v0 = vadd.f32 %v831_v55, %v167_v48  ;;  %v886_v57 = vmax.f32 %v871_v54, 0.0  ;;  %2294 = vmatpush3.bf16.msra.mxu0 %v2650_v49  ;;  %v884_v3 = vmax.f32 %v830_v53, 0.0 }
 0x126   :  { %v833_v58 = vpop.f32.mrf.mxu0  ;;  %2295 = vmatprep.subr.bf16.mxu0 %v2652_v52  ;;  %v873_v59 = vpop.f32.mrf.mxu1 }
 0x127   :  { %v885_v60 = vmax.f32 %v832_v0, 0.0  ;;  %v897_v61 = vpack.c.bf16 %v886_v57, %v886_v57  ;;  %v895_v8 = vpack.c.bf16 %v884_v3, %v884_v3 }
 0x128   :  { %v834_v4 = vpop.f32.mrf.mxu0  ;;  %v2360_v5 = vpop.f32.mrf.mxu1 }
 0x129   :  { %v896_v7 = vpack.c.bf16 %v885_v60, %v885_v60  ;;  %2296 = vmatpush3.bf16.msra.mxu0 %v2653_v62  ;;  %2368 = vmatmul.mubr.msk.bf16.vlgmr.msra.gmra.mxu1 %vm1561_vm2, %v897_v61 }
 0x12a   :  { %2406 = vmatprep.subr.mxu0 %v2658_v6  ;;  %2403 = vmatprep.mubr.msk.f32.mxu1 %vm2659_vm0, %v2658_v6 }
 0x12b   :  { %1761 = vmatprep.mubr.bf16.mxu0 %v896_v7  ;;  %2372 = vmatpush3.msra.mxu1 %v1841_v2 }
 0x12c   :  { %1762 = vmatmul.mubr.bf16.vlgmr.msra.gmra.mxu0 %v895_v8  ;;  %2373 = vmatprep.subr.mxu1 %v2658_v6 }
 0x12d   :  { %2438 = vmatprep.mubr.msk.f32.mxu0 %vm2659_vm0, %v2658_v6  ;;  %2407 = vmatpush3.msra.mxu0 %v1841_v2 }
 0x12e   :  { %2408 = vmatprep.subr.mxu0 %v2658_v6  ;;  %2374 = vmatpush3.msra.mxu1 %v1840_v9 }
 0x12f   :  { %2409 = vmatpush3.msra.mxu0 %v1840_v9  ;;  %2375 = vmatprep.subr.mxu1 %v2658_v6 }
 0x130   :  { %2410 = vmatprep.subr.mxu0 %v2658_v6  ;;  %2376 = vmatpush3.msra.mxu1 %v1839_v10 }
 0x131   :  { %2411 = vmatpush3.msra.mxu0 %v1839_v10  ;;  %2377 = vmatprep.subr.mxu1 %v2658_v6 }
 0x132   :  { %2412 = vmatprep.subr.mxu0 %v2658_v6  ;;  %2378 = vmatpush3.msra.mxu1 %v1838_v11 }
 0x133   :  { %2413 = vmatpush3.msra.mxu0 %v1838_v11  ;;  %2379 = vmatprep.subr.mxu1 %v2658_v6 }
 0x134   :  { %2414 = vmatprep.subr.mxu0 %v2658_v6  ;;  %2380 = vmatpush3.msra.mxu1 %v1837_v12 }
 0x135   :  { %2415 = vmatpush3.msra.mxu0 %v1837_v12  ;;  %2381 = vmatprep.subr.mxu1 %v2658_v6 }
 0x136   :  { %2416 = vmatprep.subr.mxu0 %v2658_v6  ;;  %2382 = vmatpush3.msra.mxu1 %v1836_v1 }
 0x137   :  { %2417 = vmatpush3.msra.mxu0 %v1836_v1  ;;  %2383 = vmatprep.subr.mxu1 %v2658_v6 }
 0x138   :  { %2418 = vmatprep.subr.mxu0 %v2658_v6  ;;  %2384 = vmatpush3.msra.mxu1 %v1835_v13 }
 0x139   :  { %2419 = vmatpush3.msra.mxu0 %v1835_v13  ;;  %2385 = vmatprep.subr.mxu1 %v2658_v6 }
 0x13a   :  { %2420 = vmatprep.subr.mxu0 %v2658_v6  ;;  %2386 = vmatpush3.msra.mxu1 %v1834_v14 }
 0x13b   :  { %2421 = vmatpush3.msra.mxu0 %v1834_v14  ;;  %2387 = vmatprep.subr.mxu1 %v2658_v6 }
 0x13c   :  { %2422 = vmatprep.subr.mxu0 %v2658_v6  ;;  %2388 = vmatpush3.msra.mxu1 %v1833_v15 }
 0x13d   :  { %2423 = vmatpush3.msra.mxu0 %v1833_v15  ;;  %2389 = vmatprep.subr.mxu1 %v2658_v6 }
 0x13e   :  { %2424 = vmatprep.subr.mxu0 %v2658_v6  ;;  %2390 = vmatpush3.msra.mxu1 %v1832_v16 }
 0x13f   :  { %2425 = vmatpush3.msra.mxu0 %v1832_v16  ;;  %2391 = vmatprep.subr.mxu1 %v2658_v6  ;;  %v1986_v16 = vld [vmem:[%s3382_s5] sm:$0x1] }
 0x140   :  { %2426 = vmatprep.subr.mxu0 %v2658_v6  ;;  %2392 = vmatpush3.msra.mxu1 %v1831_v17 }
 0x141   :  { %2427 = vmatpush3.msra.mxu0 %v1831_v17  ;;  %2393 = vmatprep.subr.mxu1 %v2658_v6 }
 0x142   :  { %2428 = vmatprep.subr.mxu0 %v2658_v6  ;;  %2394 = vmatpush3.msra.mxu1 %v1830_v18 }
 0x143   :  { %2429 = vmatpush3.msra.mxu0 %v1830_v18  ;;  %2395 = vmatprep.subr.mxu1 %v2658_v6 }
 0x144   :  { %2430 = vmatprep.subr.mxu0 %v2658_v6  ;;  %2396 = vmatpush3.msra.mxu1 %v1829_v19 }
 0x145   :  { %2431 = vmatpush3.msra.mxu0 %v1829_v19  ;;  %2397 = vmatprep.subr.mxu1 %v2658_v6  ;;  %v1990_v19 = vld [vmem:[%s3383_s6] sm:$0x1] }
 0x146   :  { %2432 = vmatprep.subr.mxu0 %v2658_v6  ;;  %2398 = vmatpush3.msra.mxu1 %v1828_v20 }
 0x147   :  { %2433 = vmatpush3.msra.mxu0 %v1828_v20  ;;  %2399 = vmatprep.subr.mxu1 %v2658_v6 }
 0x148   :  { %2434 = vmatprep.subr.mxu0 %v2658_v6  ;;  %2400 = vmatpush3.msra.mxu1 %v1827_v21 }
 0x149   :  { %2435 = vmatpush3.msra.mxu0 %v1827_v21  ;;  %2401 = vmatprep.subr.mxu1 %v2658_v6 }
 0x14a   :  { %2436 = vmatprep.subr.mxu0 %v2658_v6  ;;  %2402 = vmatpush3.msra.mxu1 %v1826_v22 }
 0x14b   :  { %2437 = vmatpush3.msra.mxu0 %v1826_v22 }
 0x1ac   :  { %v2209_v23 = vpop.f32.mrf.mxu0  ;;  %v2231_v24 = vpop.f32.mrf.mxu1 }
 0x1ae   :  { %v2210_v25 = vpop.f32.mrf.mxu0  ;;  %v2232_v26 = vpop.f32.mrf.mxu1 }
 0x1af   :  { %v2211_v39 = vadd.f32 %v2210_v25, %v2209_v23  ;;  %v2233_v6 = vadd.f32 %v2232_v26, %v2231_v24 }
 0x1b0   :  { %v2212_v27 = vpop.f32.mrf.mxu0  ;;  %v2234_v28 = vpop.f32.mrf.mxu1 }
 0x1b1   :  { %v1644_v41 = vadd.f32 %v2233_v6, %v2211_v39 }
 0x1b2   :  { %v2213_v29 = vpop.f32.mrf.mxu0  ;;  %v2235_v30 = vpop.f32.mrf.mxu1 }
 0x1cc   :  { %v2253_v31 = vpop.f32.mrf.mxu0  ;;  %v2275_v32 = vpop.f32.mrf.mxu1 }
 0x1ce   :  { %v2254_v33 = vpop.f32.mrf.mxu0  ;;  %v2276_v34 = vpop.f32.mrf.mxu1 }
 0x1cf   :  { %v2255_v40 = vadd.f32 %v2254_v33, %v2253_v31  ;;  %v2277_v44 = vadd.f32 %v2276_v34, %v2275_v32 }
 0x1d0   :  { %v2256_v36 = vpop.f32.mrf.mxu0  ;;  %v2278_v37 = vpop.f32.mrf.mxu1 }
 0x1d1   :  { %v1684_v43 = vadd.f32 %v2255_v40, %v1644_v41 }
 0x1d2   :  { %v2257_v35 = vpop.f32.mrf.mxu0  ;;  %v2279_v38 = vpop.f32.mrf.mxu1 }
 0x1d3   :  { %v1724_v49 = vadd.f32 %v2277_v44, %v1684_v43 }
 0x1e9   :  { %v1803_v42 = vpop.f32.mrf.mxu1 }
 0x1eb   :  { %v2369_v45 = vpop.f32.mrf.mxu1 }
 0x1ec   :  { %v2297_v46 = vpop.f32.mrf.mxu0 }
 0x1ed   :  { %v1806_v47 = vpop.f32.mrf.mxu1 }
 0x1ee   :  { %v2298_v48 = vpop.f32.mrf.mxu0 }
 0x1ef   :  { %v2299_v50 = vadd.f32 %v2298_v48, %v2297_v46  ;;  %v2370_v51 = vpop.f32.mrf.mxu1 }
 0x1f0   :  { %v2300_v52 = vpop.f32.mrf.mxu0 }
 0x1f1   :  { %v1764_v53 = vadd.f32 %v2299_v50, %v1724_v49 }
 0x1f2   :  { %v2301_v54 = vpop.f32.mrf.mxu0 }
 0x1f3   :  { %v1804_v55 = vadd.f32 %v1803_v42, %v1764_v53 }
 0x1f5   :  { %v1813_v56 = vrot.slane %v1804_v55, 4  ;;  %v1819_v0 = vmul.f32 %v1804_v55, %v1804_v55 }
 0x1f7   :  { %v1814_v57 = vadd.f32 %v1813_v56, %v1804_v55  ;;  %v1820_v62 = vrot.slane %v1819_v0, 4 }
 0x1f9   :  { %v1815_v3 = vrot.slane %v1814_v57, 2  ;;  %v1821_v58 = vadd.f32 %v1820_v62, %v1819_v0 }
 0x1fb   :  { %v1816_v59 = vadd.f32 %v1815_v3, %v1814_v57  ;;  %v1822_v60 = vrot.slane %v1821_v58, 2 }
 0x1fd   :  { %v1817_v61 = vrot.slane %v1816_v59, 1  ;;  %v1823_v4 = vadd.f32 %v1822_v60, %v1821_v58 }
 0x1ff   :  { %v1818_v5 = vadd.f32 %v1817_v61, %v1816_v59  ;;  %v1824_v7 = vrot.slane %v1823_v4, 1 }
 0x201   :  { %2404 = vmatmul.mubr.f32.vlgmr.msra.gmra.mxu1 %v1818_v5  ;;  %v1825_v8 = vadd.f32 %v1824_v7, %v1823_v4 }
 0x203   :  { %2439 = vmatmul.mubr.f32.vlgmr.msra.gmra.mxu0 %v1825_v8 }
 0x2c1   :  { %v1908_v2 = vpop.f32.mrf.mxu1 }
 0x2c2   :  { %v1982_v9 = vmul.f32 0.00625, %v1908_v2 }
 0x2c3   :  { %v2405_v10 = vpop.f32.mrf.mxu1  ;;  %v1978_v11 = vpop.f32.mrf.mxu0 }
 0x2c4   :  { %v1984_v12 = vmul.f32 %v1982_v9, %v1982_v9  ;;  %v1983_v1 = vmul.f32 0.00625, %v1978_v11 }
 0x2c5   :  { %v2440_v13 = vpop.f32.mrf.mxu0 }
 0x2c6   :  { %v1985_v14 = vsub.f32 %v1983_v1, %v1984_v12 }
 0x2c8   :  { %v1987_v15 = vadd.f32 1e-05, %v1985_v14 }
 0x2ca   :  { %2655 = vrsqrt.f32 %v1987_v15 }
 0x2d7   :  { %v2656_v17 = vpop.eup %2655 }
 0x2d8   :  { %v1989_v18 = vmul.f32 %v2656_v17, %v1986_v16 }
 0x2da   :  { %v1991_v20 = vmul.f32 %v1989_v18, %v1982_v9  ;;  %v1997_v21 = vrot.slane %v1989_v18, %v3095_v63 }
 0x2dc   :  { %v1992_v22 = vsub.f32 %v1990_v19, %v1991_v20  ;;  %v1999_v23 = vmul.f32 %v1997_v21, %v1804_v55 }
 0x2de   :  { %v2004_v24 = vrot.slane %v1992_v22, %v3095_v63 }
 0x2e0   :  { %v2006_v25 = vadd.f32 %v2004_v24, %v1999_v23 }
 0x2e2   :  { %2007 = vst [vmem:[%s3384_s7] sm:$0xff] %v2006_v25 }

</bundles_post_ra>
